<compile_context>
chip_gen: v7x
topology: tpu7x:2x2x1
jax: 0.10.0
libtpu: 0.0.40
codegen_flags: <defaults>
</compile_context>

<pallas_src>
import math
import numpy as np
import jax
import jax.numpy as jnp
from jax.experimental import pallas as pl
from jax.experimental.pallas import tpu as pltpu

RATIO = 0.5  # SAGPooling default ratio


def _round_up(n, m):
    return ((n + m - 1) // m) * m


# ---------------------------------------------------------------------------
# Kernel 1: GCNConv scorer  (score^T = h^T @ A_hat, h = X @ w)
# ---------------------------------------------------------------------------

def _gcn_score_kernel(h_ref, a_ref, b_ref, out_ref, acc_ref):
    k = pl.program_id(1)

    @pl.when(k == 0)
    def _():
        acc_ref[...] = jnp.zeros_like(acc_ref)

    # (8, TK) bf16 @ (TK, TN) bf16 -> f32 accumulate (MXU)
    acc_ref[...] += jnp.dot(h_ref[...], a_ref[...],
                            preferred_element_type=jnp.float32)

    @pl.when(k == pl.num_programs(1) - 1)
    def _():
        out_ref[...] = acc_ref[...] + b_ref[0]


def gcn_score(a_hat_pad, h, b):
    """scores = A_hat @ h + b, computed as h^T @ A_hat (A_hat symmetric, bf16 operands,
    f32 accumulation).  a_hat_pad: (N_pad, N_pad) bf16, N_pad % 256 == 0.  h: (N,) f32."""
    n_pad = a_hat_pad.shape[0]
    n = h.shape[0]
    assert n_pad % 256 == 0 and n <= n_pad

    tn = 256                                    # output-lane tile (multiple of 128 & 256)
    tk = 512 if n_pad % 512 == 0 else 256       # contraction tile (>=512 when it divides)

    # h^T padded to 8 sublanes (rows 1..7 zero), bf16 for the MXU.
    h_p = jnp.zeros((8, n_pad), jnp.bfloat16).at[0, :n].set(h.astype(jnp.bfloat16))
    b_sc = jnp.asarray(b, jnp.float32).reshape((1,))

    out = pl.pallas_call(
        _gcn_score_kernel,
        out_shape=jax.ShapeDtypeStruct((8, n_pad), jnp.float32),
        grid=(n_pad // tn, n_pad // tk),
        in_specs=[
            pl.BlockSpec((8, tk), lambda j, k: (0, k)),          # h^T tile
            pl.BlockSpec((tk, tn), lambda j, k: (k, j)),         # A_hat tile
            pl.BlockSpec(memory_space=pltpu.MemorySpace.SMEM),   # bias scalar
        ],
        out_specs=pl.BlockSpec((8, tn), lambda j, k: (0, j)),    # lane-dense output slab
        scratch_shapes=[pltpu.VMEM((8, tn), jnp.float32)],       # f32 accumulator
        compiler_params=pltpu.CompilerParams(
            dimension_semantics=("parallel", "arbitrary"),
            vmem_limit_bytes=32 * 1024 * 1024,
        ),
    )(h_p, a_hat_pad, b_sc)
    return out[0, :n]


# ---------------------------------------------------------------------------
# Kernel 2: fused gather + tanh gate  (x_out[i] = x[perm[i]] * tanh(score[perm[i]]))
# ---------------------------------------------------------------------------

def _sag_gather_scale_kernel(perm_ref, x_ref, score_ref, out_ref):
    t = pl.program_id(0)
    for r in range(8):                      # unrolled: 8 output rows per grid step
        row = perm_ref[t * 8 + r]           # node index from SMEM (scalar prefetch)
        row_x = x_ref[pl.ds(row, 1), :]     # dynamic-index row load from VMEM-resident x
        gate = jnp.tanh(jnp.full(row_x.shape, score_ref[row], jnp.float32))
        out_ref[pl.ds(r, 1), :] = row_x * gate


def sag_gather_scale(x, score, perm):
    """SAGPooling node update with the x[perm] gather fused into the kernel."""
    n, f = x.shape
    k = perm.shape[0]
    f_pad = _round_up(max(f, 1), 128)
    n_pad8 = _round_up(max(n, 1), 8)
    k_pad = _round_up(max(k, 1), 8)

    x_p = jnp.zeros((n_pad8, f_pad), jnp.float32).at[:n, :f].set(x)
    perm_p = jnp.zeros((k_pad,), jnp.int32).at[:k].set(perm.astype(jnp.int32))

    out = pl.pallas_call(
        _sag_gather_scale_kernel,
        out_shape=jax.ShapeDtypeStruct((k_pad, f_pad), jnp.float32),
        grid_spec=pltpu.PrefetchScalarGridSpec(
            num_scalar_prefetch=1,                                   # perm -> SMEM
            grid=(k_pad // 8,),
            in_specs=[
                pl.BlockSpec((n_pad8, f_pad), lambda t, p: (0, 0)),  # x resident in VMEM
                pl.BlockSpec(memory_space=pltpu.MemorySpace.SMEM),   # scores in SMEM
            ],
            out_specs=pl.BlockSpec((8, f_pad), lambda t, p: (t, 0)),  # lane-dense output
        ),
        compiler_params=pltpu.CompilerParams(
            dimension_semantics=("parallel",),
            vmem_limit_bytes=32 * 1024 * 1024,
        ),
    )(perm_p, x_p, score.astype(jnp.float32))
    return out[:k, :f]


# ---------------------------------------------------------------------------
# Glue (host / XLA): normalized adjacency, per-graph top-k, edge filtering
# ---------------------------------------------------------------------------

def gcn_norm_adj_padded(edge_index, num_nodes, n_pad):
    """Dense Â = D^-1/2 (A+I) D^-1/2 built directly at the padded size (numpy, f32).
    Padding rows/cols are zero so they contribute nothing to the matmul."""
    a_hat = np.zeros((n_pad, n_pad), np.float32)
    a_hat[edge_index[0], edge_index[1]] = 1.0
    idx = np.arange(num_nodes)
    a_hat[idx, idx] += 1.0
    deg = a_hat.sum(axis=1)
    dinv = np.zeros_like(deg)
    nz = deg > 0.0
    dinv[nz] = deg[nz] ** -0.5
    return (dinv[:, None] * a_hat * dinv[None, :]).astype(np.float32)


def device_topk_perm(score, batch_np, ratio):
    """Per-graph top-ceil(ratio*n_g) node indices, kept on device (no D2H of the scores).
    Graph segment boundaries come from the (host-side, static) batch vector."""
    batch_np = np.asarray(batch_np)
    _, starts, counts = np.unique(batch_np, return_index=True, return_counts=True)
    perms = []
    for s, c in zip(starts.tolist(), counts.tolist()):
        k = int(math.ceil(ratio * c))
        _, idx = jax.lax.top_k(jax.lax.slice_in_dim(score, s, s + c), k)
        perms.append(idx.astype(jnp.int32) + np.int32(s))
    return jnp.concatenate(perms)


def filter_adj(edge_index, perm, num_nodes):
    """Keep edges whose both endpoints survive pooling; relabel to positions in perm (host —
    output size is data-dependent)."""
    relabel = np.full(num_nodes, -1, np.int64)
    relabel[perm] = np.arange(perm.shape[0])
    row, col = edge_index[0], edge_index[1]
    keep = (relabel[row] >= 0) & (relabel[col] >= 0)
    return np.stack([relabel[row][keep], relabel[col][keep]], axis=0)


# ---------------------------------------------------------------------------
# PoolGraph.forward
# ---------------------------------------------------------------------------

def pool_graph_forward(x, edge_index, batch, w, b, ratio=RATIO):
    n, f = x.shape
    n_pad = _round_up(max(n, 1), 256)
    edge_np = np.asarray(edge_index)
    batch_np = np.asarray(batch)

    # Dense normalized adjacency built at padded size on host, shipped as bf16 MXU operand.
    a_hat = jnp.asarray(gcn_norm_adj_padded(edge_np, n, n_pad), dtype=jnp.bfloat16)
    # Tiny matvec h = X @ w done in the wrapper (F ~ 8-16), no (F_pad,128) zero-padded W.
    h = jnp.matmul(x, w)[:, 0]

    score = gcn_score(a_hat, h, b)                    # Pallas kernel 1 (GCNConv scorer)
    perm = device_topk_perm(score, batch_np, ratio)   # on-device top-k per graph
    x_out = sag_gather_scale(x, score, perm)          # Pallas kernel 2 (fused gather + tanh gate)

    # Data-dependent edge filtering stays on host (overlaps with the async kernel above).
    perm_np = np.asarray(jax.device_get(perm)).astype(np.int64)
    edge_index_out = filter_adj(edge_np, perm_np, n)
    batch_out = batch_np[perm_np]
    return (x_out,
            jnp.asarray(edge_index_out, jnp.int32),
            jnp.asarray(batch_out, jnp.int32))


# ---------------------------------------------------------------------------
# Demo / self-test
# ---------------------------------------------------------------------------

if __name__ == "__main__":
    key = jax.random.PRNGKey(0)
    k1, k2, k3, k4 = jax.random.split(key, 4)

    def ring_edges(offset, n):
        src = np.arange(n)
        dst = (src + 1) % n
        return np.stack([np.concatenate([src, dst]),
                         np.concatenate([dst, src])]) + offset

    def make_case(n_per, f, kx, kw):
        N = 2 * n_per
        x = jax.random.normal(kx, (N, f), jnp.float32)
        edge_index = np.concatenate([ring_edges(0, n_per), ring_edges(n_per, n_per)],
                                    axis=1).astype(np.int32)
        batch = np.concatenate([np.zeros(n_per, np.int32), np.ones(n_per, np.int32)])
        w = jax.random.normal(kw, (f, 1), jnp.float32) * float(np.sqrt(6.0 / (f + 1)))
        b = jnp.zeros((1,), jnp.float32)
        return x, edge_index, batch, w, b

    def check_kernels(x, edge_index, batch, w, b):
        """Unit-check both Pallas kernels against f32 references (loose tol on the score
        because the MXU operands are bf16)."""
        n, f = x.shape
        n_pad = _round_up(max(n, 1), 256)
        a_pad = gcn_norm_adj_padded(np.asarray(edge_index), n, n_pad)
        h_np = np.asarray(x) @ np.asarray(w)
        score_k = np.asarray(gcn_score(jnp.asarray(a_pad, dtype=jnp.bfloat16),
                                       jnp.asarray(h_np[:, 0]), b))
        score_ref = a_pad[:n, :n] @ h_np[:, 0] + float(np.asarray(b)[0])
        assert np.allclose(score_k, score_ref, rtol=5e-2, atol=5e-2), (
            "GCN score mismatch, max err %g" % np.abs(score_k - score_ref).max())

        perm = device_topk_perm(jnp.asarray(score_k), np.asarray(batch), RATIO)
        xo_k = np.asarray(sag_gather_scale(x, jnp.asarray(score_k), perm))
        p = np.asarray(perm)
        xo_ref = np.asarray(x)[p] * np.tanh(score_k[p])[:, None]
        assert np.allclose(xo_k, xo_ref, rtol=1e-3, atol=1e-3), (
            "gather/scale mismatch, max err %g" % np.abs(xo_k - xo_ref).max())

    # Case 1: the original toy graph (2 rings x 6 nodes, F=8)  -> single-tile grid.
    # Case 2: 2 rings x 260 nodes, F=16 -> N_pad=768, exercises the 3x3 tiled grid with
    #         accumulation over the contraction axis and a 33-step gather grid.
    for (n_per, f, kx, kw) in [(6, 8, k1, k2), (260, 16, k3, k4)]:
        x, edge_index, batch, w, b = make_case(n_per, f, kx, kw)
        check_kernels(x, edge_index, batch, w, b)

        x_out, ei_out, b_out = pool_graph_forward(x, edge_index, batch, w, b)
        jax.block_until_ready(x_out)

        k_expect = 2 * int(math.ceil(RATIO * n_per))
        assert x_out.shape == (k_expect, f)
        assert ei_out.shape[0] == 2
        assert b_out.shape == (k_expect,)

    print("KERNEL_OK")
</pallas_src>

<mosaic_0001>
module attributes {stable_mosaic.version = 11 : i64} {
  func.func @_gcn_score_kernel(%arg0: i32, %arg1: i32, %arg2: memref<8x256xbf16, #tpu.memory_space<vmem>>, %arg3: memref<256x256xbf16, #tpu.memory_space<vmem>>, %arg4: memref<1xf32, #tpu.memory_space<smem>>, %arg5: memref<8x256xf32, #tpu.memory_space<vmem>>, %arg6: memref<8x256xf32, #tpu.memory_space<vmem>>) attributes {dimension_semantics = [#tpu.dimension_semantics<parallel>, #tpu.dimension_semantics<arbitrary>], iteration_bounds = array<i64: 1, 1>, scalar_prefetch = 0 : i64, scratch_operands = 1 : i64, tpu.core_type = #tpu.core_type<tc>, window_params = [{transform_indices = @transform_0, window_bounds = array<i64: 8, 256>}, {transform_indices = @transform_1, window_bounds = array<i64: 256, 256>}, {transform_indices = @transform_2, window_bounds = array<i64: 1>}, {transform_indices = @transform_3, window_bounds = array<i64: 8, 256>}]} {
    %c0_i32 = arith.constant 0 : i32
    %0 = arith.cmpi eq, %arg1, %c0_i32 : i32
    %1 = arith.extui %0 : i1 to i32
    %c0_i32_0 = arith.constant 0 : i32
    %2 = arith.cmpi ne, %1, %c0_i32_0 : i32
    scf.if %2 {
      %cst_10 = arith.constant 0.000000e+00 : f32
      %12 = vector.broadcast %cst_10 : f32 to vector<8x256xf32>
      %c0_11 = arith.constant 0 : index
      %c0_12 = arith.constant 0 : index
      %13 = vector.load %arg6[%c0_11, %c0_12] : memref<8x256xf32, #tpu.memory_space<vmem>>, vector<8x256xf32>
      tpu.vector_store %arg6[%c0_11, %c0_12], %12 {strides = array<i32>} : memref<8x256xf32, #tpu.memory_space<vmem>>, vector<8x256xf32>,
    } else {
    }
    %c0 = arith.constant 0 : index
    %c0_1 = arith.constant 0 : index
    %3 = vector.load %arg6[%c0, %c0_1] : memref<8x256xf32, #tpu.memory_space<vmem>>, vector<8x256xf32>
    %c0_2 = arith.constant 0 : index
    %c0_3 = arith.constant 0 : index
    %4 = vector.load %arg2[%c0_2, %c0_3] : memref<8x256xbf16, #tpu.memory_space<vmem>>, vector<8x256xbf16>
    %c0_4 = arith.constant 0 : index
    %c0_5 = arith.constant 0 : index
    %5 = vector.load %arg3[%c0_4, %c0_5] : memref<256x256xbf16, #tpu.memory_space<vmem>>, vector<256x256xbf16>
    %cst = arith.constant dense<0.000000e+00> : vector<8x256xf32>
    %6 = tpu.matmul %4, %5, %cst {dimension_numbers = #tpu.dot_dimension_numbers<[1], [0], [0], [1], [0, 0, 1, 1], [], []>} : vector<8x256xbf16>, vector<256x256xbf16>, vector<8x256xf32> -> vector<8x256xf32>
    %7 = arith.addf %3, %6 : vector<8x256xf32>
    %c0_6 = arith.constant 0 : index
    %c0_7 = arith.constant 0 : index
    %8 = vector.load %arg6[%c0_6, %c0_7] : memref<8x256xf32, #tpu.memory_space<vmem>>, vector<8x256xf32>
    tpu.vector_store %arg6[%c0_6, %c0_7], %7 {strides = array<i32>} : memref<8x256xf32, #tpu.memory_space<vmem>>, vector<8x256xf32>,
    %c0_i32_8 = arith.constant 0 : i32
    %9 = arith.cmpi eq, %arg1, %c0_i32_8 : i32
    %10 = arith.extui %9 : i1 to i32
    %c0_i32_9 = arith.constant 0 : i32
    %11 = arith.cmpi ne, %10, %c0_i32_9 : i32
    scf.if %11 {
      %c0_10 = arith.constant 0 : index
      %c0_11 = arith.constant 0 : index
      %12 = vector.load %arg6[%c0_10, %c0_11] : memref<8x256xf32, #tpu.memory_space<vmem>>, vector<8x256xf32>
      %c0_12 = arith.constant 0 : index
      %13 = memref.load %arg4[%c0_12] : memref<1xf32, #tpu.memory_space<smem>>
      %14 = vector.broadcast %13 : f32 to vector<8x256xf32>
      %15 = arith.addf %12, %14 : vector<8x256xf32>
      %c0_13 = arith.constant 0 : index
      %c0_14 = arith.constant 0 : index
      %16 = vector.load %arg5[%c0_13, %c0_14] : memref<8x256xf32, #tpu.memory_space<vmem>>, vector<8x256xf32>
      tpu.vector_store %arg5[%c0_13, %c0_14], %15 {strides = array<i32>} : memref<8x256xf32, #tpu.memory_space<vmem>>, vector<8x256xf32>,
    } else {
    }
    return
  }
  func.func @transform_0(%arg0: i32, %arg1: i32) -> (i32, i32) {
    %c0_i32 = arith.constant 0 : i32
    %c0_i32_0 = arith.constant 0 : i32
    return %c0_i32, %arg1 : i32, i32
  }
  func.func @transform_1(%arg0: i32, %arg1: i32) -> (i32, i32) {
    %c0_i32 = arith.constant 0 : i32
    return %arg1, %arg0 : i32, i32
  }
  func.func @transform_2(%arg0: i32, %arg1: i32) -> i32 {
    %c0_i32 = arith.constant 0 : i32
    %c0_i32_0 = arith.constant 0 : i32
    return %c0_i32 : i32
  }
  func.func @transform_3(%arg0: i32, %arg1: i32) -> (i32, i32) {
    %c0_i32 = arith.constant 0 : i32
    %c0_i32_0 = arith.constant 0 : i32
    return %c0_i32, %arg0 : i32, i32
  }
}

</mosaic_0001>

<bundles_post_ra>
// kernel: tpu_custom_call.1
= control target key start
LH: loop header
LB: loop body
LE: loop exit
PB: predicated region body
PF: predicated region fallthrough
CT: control target
= control target key end

     0   :  { %9 = vsyncpa [#allocation5], 0  ;;  %s554_s0 = inlined_call_operand.hbm [shape: bf16[8,256], index: 0, kind: input, shape index: {}]   ;;  %s555_s1 = inlined_call_operand.hbm [shape: bf16[256,256], index: 1, kind: input, shape index: {}]   ;;  %s556_s2 = inlined_call_operand.<no memory space> [shape: f32[1], index: 2, kind: input, shape index: {}]   ;;  %s557_s3 = inlined_call_operand.hbm [shape: f32[8,256], index: 3, kind: output, shape index: {}]  }
   0x1   :  { %10 = vsyncpa [#allocation8], 0 }
   0x2   :  { %11 = vsyncpa [#allocation6], 0  ;;  %s483_s12 = smov [#allocation4]   ;;  %s484_s14 = smov [#allocation7]  }
   0x3   :  { %s18_s13 = sshll.u32 %s483_s12, 4  ;;  %s27_s15 = sshll.u32 %s484_s14, 4  ;;  %s19_s13 = int_to_ptr.vmem [resolvable:$true] %s18_s13  ;;  %s508_s15 = int_to_ptr.vmem [resolvable:$true] %s27_s15 }
   0x4   :  { %s411_s18 = scalar_lea.hbm %s554_s0, 128 }
   0x5   :  { %p412_p0 = scmp.ne.s32.totalorder %s554_s0, %s411_s18  ;;  %p415_p1 = scmp.lt.u32.totalorder %s411_s18, %s554_s0 }
   0x7   :  { %p417_p2 = pnand %p415_p1, %p412_p0 }
   0x9   :  { %420 = shalt.err (!%p417_p2)
}
   0xa   :  { %s421_s23 = scalar_lea.vmem %s19_s13, 128  ;;  %p426_p4 = scmp.lt.s32.totalorder %s19_s13, %s19_s13 }
   0xb   :  { %p422_p3 = scmp.ne.s32.totalorder %s19_s13, %s421_s23  ;;  %p427_p5 = scmp.lt.s32.totalorder %s421_s23, %s421_s23 }
   0xd   :  { %p428_p6 = por %p427_p5, %p426_p4 }
   0xf   :  { %p429_p7 = pnand %p428_p6, %p422_p3 }
  0x11   :  { %432 = shalt.err (!%p429_p7)
}
  0x12   :  { %21 = dma.hbm_to_vmem [thread:$0]  %s554_s0, 128, %s19_s13, [#allocation5]  }
  0x13   :  { %s433_s28 = scalar_lea.hbm %s555_s1, 4096 }
  0x14   :  { %p434_p8 = scmp.ne.s32.totalorder %s555_s1, %s433_s28  ;;  %p437_p9 = scmp.lt.u32.totalorder %s433_s28, %s555_s1 }
  0x16   :  { %p439_p10 = pnand %p437_p9, %p434_p8 }
  0x18   :  { %442 = shalt.err (!%p439_p10)
}
  0x19   :  { %s443_s6 = scalar_lea.vmem %s508_s15, 4096  ;;  %p448_p12 = scmp.lt.s32.totalorder %s508_s15, %s508_s15 }
  0x1a   :  { %p444_p11 = scmp.ne.s32.totalorder %s508_s15, %s443_s6  ;;  %p449_p13 = scmp.lt.s32.totalorder %s443_s6, %s443_s6 }
  0x1c   :  { %p450_p0 = por %p449_p13, %p448_p12 }
  0x1e   :  { %p451_p1 = pnand %p450_p0, %p444_p11 }
  0x20   :  { %454 = shalt.err (!%p451_p1)
}
  0x21   :  { %s485_s0 = smov 128   ;;  %s486_s7 = smov 8  }
  0x22   :  { %33 = dma.hbm_to_vmem [thread:$0]  %s555_s1, 4096, %s508_s15, [#allocation8], %s485_s0, %s485_s0, %s486_s7  }
  0x23   :  { %477 = dma.done.wait [#allocation5], 128  }
  0x24   :  { %478 = vsyncadd [#allocation5], 4294967168 }
  0x25   :  { %479 = dma.done.wait [#allocation8], 4096  }
  0x26   :  { %480 = vsyncadd [#allocation8], 4294963200  ;;  %v361_v0 = vld [vmem:[#allocation7 + $0x4] ss:$8 sps:$4 sm:$0xff]   ;;  %v363_v1 = vld [vmem:[#allocation7] ss:$8 sps:$4 sm:$0xff]   ;;  %v301_v35 = vstv %s556_s2 }
  0x27   :  { %250 = vmatprep.subr.bf16.mxu0 %v361_v0  ;;  %v364_v2 = vld [vmem:[#allocation7 + $0x14] ss:$8 sps:$4 sm:$0xff]   ;;  %v366_v3 = vld [vmem:[#allocation7 + $0x10] ss:$8 sps:$4 sm:$0xff]   ;;  %v367_v4 = vld [vmem:[#allocation7 + $0x24] ss:$8 sps:$4 sm:$0xff]  }
  0x28   :  { %251 = vmatpush1.bf16.msra.mxu0 %v363_v1  ;;  %v369_v5 = vld [vmem:[#allocation7 + $0x20] ss:$8 sps:$4 sm:$0xff]   ;;  %v370_v6 = vld [vmem:[#allocation7 + $0x34] ss:$8 sps:$4 sm:$0xff]   ;;  %v372_v7 = vld [vmem:[#allocation7 + $0x30] ss:$8 sps:$4 sm:$0xff]  }
  0x29   :  { %252 = vmatprep.subr.bf16.mxu0 %v364_v2  ;;  %v373_v8 = vld [vmem:[#allocation7 + $0x44] ss:$8 sps:$4 sm:$0xff]   ;;  %v375_v9 = vld [vmem:[#allocation7 + $0x40] ss:$8 sps:$4 sm:$0xff]   ;;  %v376_v10 = vld [vmem:[#allocation7 + $0x54] ss:$8 sps:$4 sm:$0xff]  }
  0x2a   :  { %v378_v11 = vld [vmem:[#allocation7 + $0x50] ss:$8 sps:$4 sm:$0xff]   ;;  %v379_v12 = vld [vmem:[#allocation7 + $0x64] ss:$8 sps:$4 sm:$0xff]   ;;  %v381_v15 = vld [vmem:[#allocation7 + $0x60] ss:$8 sps:$4 sm:$0xff]  }
  0x2b   :  { %v50_v13 = vld [vmem:[#allocation4] sm:$0xff]  ;;  %v385_v18 = vld [vmem:[#allocation7 + $0x84] ss:$8 sps:$4 sm:$0xff]   ;;  %v387_v19 = vld [vmem:[#allocation7 + $0x80] ss:$8 sps:$4 sm:$0xff]   ;;  %s487_s11 = smov [#allocation9]  }
  0x2c   :  { %253 = vmatpush1.bf16.msra.mxu0 %v366_v3  ;;  %v323_v14 = vcombine.high %v50_v13, %v50_v13  ;;  %v382_v16 = vld [vmem:[#allocation7 + $0x74] ss:$8 sps:$4 sm:$0xff]   ;;  %v384_v17 = vld [vmem:[#allocation7 + $0x70] ss:$8 sps:$4 sm:$0xff]   ;;  %v391_v22 = vld [vmem:[#allocation7 + $0xa4] ss:$8 sps:$4 sm:$0xff]   ;;  %v322_v34 = vcombine.low %v50_v13, %v50_v13 }
  0x2d   :  { %254 = vmatprep.subr.bf16.mxu0 %v367_v4  ;;  %v388_v20 = vld [vmem:[#allocation7 + $0x94] ss:$8 sps:$4 sm:$0xff]   ;;  %v390_v21 = vld [vmem:[#allocation7 + $0x90] ss:$8 sps:$4 sm:$0xff]   ;;  %v393_v23 = vld [vmem:[#allocation7 + $0xa0] ss:$8 sps:$4 sm:$0xff]  }
  0x2e   :  { %282 = vmatprep.mubr.bf16.mxu0 %v323_v14  ;;  %v394_v24 = vld [vmem:[#allocation7 + $0xb4] ss:$8 sps:$4 sm:$0xff]   ;;  %v396_v25 = vld [vmem:[#allocation7 + $0xb0] ss:$8 sps:$4 sm:$0xff]   ;;  %v397_v26 = vld [vmem:[#allocation7 + $0xc4] ss:$8 sps:$4 sm:$0xff]  }
  0x2f   :  { %v399_v27 = vld [vmem:[#allocation7 + $0xc0] ss:$8 sps:$4 sm:$0xff]   ;;  %v400_v28 = vld [vmem:[#allocation7 + $0xd4] ss:$8 sps:$4 sm:$0xff]   ;;  %v402_v29 = vld [vmem:[#allocation7 + $0xd0] ss:$8 sps:$4 sm:$0xff]  }
  0x30   :  { %255 = vmatpush1.bf16.msra.mxu0 %v369_v5  ;;  %v403_v30 = vld [vmem:[#allocation7 + $0xe4] ss:$8 sps:$4 sm:$0xff]   ;;  %v405_v31 = vld [vmem:[#allocation7 + $0xe0] ss:$8 sps:$4 sm:$0xff]   ;;  %v406_v32 = vld [vmem:[#allocation7 + $0xf4] ss:$8 sps:$4 sm:$0xff]  }
  0x31   :  { %256 = vmatprep.subr.bf16.mxu0 %v370_v6  ;;  %v408_v33 = vld [vmem:[#allocation7 + $0xf0] ss:$8 sps:$4 sm:$0xff]   ;;  %s312_s12 = sshll.u32 %s487_s11, 4  ;;  %s313_s12 = int_to_ptr.vmem [resolvable:$true] %s312_s12 }
  0x32   :  { %s455_s13 = scalar_lea.vmem %s313_s12, 256  ;;  %p460_p3 = scmp.lt.s32.totalorder %s313_s12, %s313_s12 }
  0x33   :  { %p456_p2 = scmp.ne.s32.totalorder %s313_s12, %s455_s13  ;;  %p461_p4 = scmp.lt.s32.totalorder %s455_s13, %s455_s13 }
  0x34   :  { %257 = vmatpush1.bf16.msra.mxu0 %v372_v7 }
  0x35   :  { %258 = vmatprep.subr.bf16.mxu0 %v373_v8  ;;  %p462_p5 = por %p461_p4, %p460_p3 }
  0x37   :  { %p463_p6 = pnand %p462_p5, %p456_p2 }
  0x38   :  { %259 = vmatpush1.bf16.msra.mxu0 %v375_v9 }
  0x39   :  { %260 = vmatprep.subr.bf16.mxu0 %v376_v10 }
  0x3c   :  { %261 = vmatpush1.bf16.msra.mxu0 %v378_v11 }
  0x3d   :  { %262 = vmatprep.subr.bf16.mxu0 %v379_v12 }
  0x40   :  { %263 = vmatpush1.bf16.msra.mxu0 %v381_v15 }
  0x41   :  { %264 = vmatprep.subr.bf16.mxu0 %v382_v16 }
  0x44   :  { %265 = vmatpush1.bf16.msra.mxu0 %v384_v17 }
  0x45   :  { %266 = vmatprep.subr.bf16.mxu0 %v385_v18 }
  0x48   :  { %267 = vmatpush1.bf16.msra.mxu0 %v387_v19 }
  0x49   :  { %268 = vmatprep.subr.bf16.mxu0 %v388_v20 }
  0x4c   :  { %269 = vmatpush1.bf16.msra.mxu0 %v390_v21 }
  0x4d   :  { %270 = vmatprep.subr.bf16.mxu0 %v391_v22 }
  0x50   :  { %271 = vmatpush1.bf16.msra.mxu0 %v393_v23 }
  0x51   :  { %272 = vmatprep.subr.bf16.mxu0 %v394_v24 }
  0x54   :  { %273 = vmatpush1.bf16.msra.mxu0 %v396_v25 }
  0x55   :  { %274 = vmatprep.subr.bf16.mxu0 %v397_v26 }
  0x58   :  { %275 = vmatpush1.bf16.msra.mxu0 %v399_v27 }
  0x59   :  { %276 = vmatprep.subr.bf16.mxu0 %v400_v28 }
  0x5c   :  { %277 = vmatpush1.bf16.msra.mxu0 %v402_v29 }
  0x5d   :  { %278 = vmatprep.subr.bf16.mxu0 %v403_v30 }
  0x60   :  { %279 = vmatpush1.bf16.msra.mxu0 %v405_v31 }
  0x61   :  { %280 = vmatprep.subr.bf16.mxu0 %v406_v32 }
  0x64   :  { %281 = vmatpush1.bf16.msra.mxu0 %v408_v33 }
  0x67   :  { %283 = vmatmul.mubr.bf16.vlgmr.msra.gmra.mrb[0].mxu0 %v322_v34 }
 0x13a   :  { %v284_v36 = vpop.f32.mrb[0].mxu0 }
 0x13b   :  { %v302_v37 = vadd.f32 %v301_v35, %v284_v36  ;;  %v286_v38 = vpop.f32.mrb[1].mxu0 }
 0x13c   :  { %v303_v39 = vadd.f32 %v301_v35, %v286_v38  ;;  %v288_v40 = vpop.f32.mrb[2].mxu0 }
 0x13d   :  { %304 = vst [vmem:[#allocation9] sm:$0xff] %v302_v37  ;;  %v289_v41 = vpop.f32.mrb[3].mxu0 }
 0x13e   :  { %305 = vst [vmem:[#allocation9 + $0x8] sm:$0xff] %v303_v39 }
 0x13f   :  { %466 = shalt.err (!%p463_p6)
}
 0x140   :  { %s467_s15 = scalar_lea.hbm %s557_s3, 256 }
 0x141   :  { %p468_p7 = scmp.ne.s32.totalorder %s557_s3, %s467_s15  ;;  %p471_p8 = scmp.lt.u32.totalorder %s467_s15, %s557_s3 }
 0x143   :  { %p473_p9 = pnand %p471_p8, %p468_p7 }
 0x145   :  { %476 = shalt.err (!%p473_p9)
}
 0x146   :  { %315 = dma.vmem_to_hbm [thread:$0]  %s313_s12, 256, %s557_s3, [#allocation6]  }
 0x147   :  { %481 = dma.done.wait [#allocation6], 256  }
 0x148   :  { %482 = vsyncadd [#allocation6], 4294967040 }
 0x149   :  { %319 = vsyncpa [#allocation5], 1 }
 0x14a   :  { %320 = vsyncpa [#allocation8], 1 }
 0x14b   :  { %321 = vsyncpa [#allocation6], 1 }

</bundles_post_ra>
